<compile_context>
chip_gen: v7x
topology: tpu7x:2x2x1
jax: 0.10.0
libtpu: 0.0.40
codegen_flags: <defaults>
</compile_context>

<pallas_src>
import jax
import jax.numpy as jnp
from jax.experimental import pallas as pl
from jax.experimental.pallas import tpu as pltpu


_TINY_BYTES = 256 * 1024                    # below this: single block, no pipeline
_LANE = 128                                 # TPU lane width
_FALLBACK_VMEM_BYTES = 64 * 1024 * 1024     # smallest per-TC VMEM across v5e/v6e/v7x


def _vmem_capacity_bytes() -> int:
    """Per-core VMEM capacity; conservative fallback if the query is unavailable."""
    try:
        cap = int(pltpu.get_tpu_info().vmem_capacity_bytes)
        if cap > 0:
            return cap
    except Exception:
        pass
    return _FALLBACK_VMEM_BYTES


def _vmem_limit_bytes() -> int:
    """Explicit scoped-VMEM limit (v5e's 16 MiB default is too small otherwise)."""
    return min(int(_vmem_capacity_bytes() * 3 // 4), 96 * 1024 * 1024)


def _softmax_rows_kernel(a_ref, o_ref):
    """Numerically stable row-wise softmax over the last (lane) axis of the block."""
    a = a_ref[...].astype(jnp.float32)
    row_max = jnp.max(a, axis=-1, keepdims=True)
    e = jnp.exp(a - row_max)
    denom = jnp.sum(e, axis=-1, keepdims=True)
    # Exact division (not approx reciprocal): VPU/EUP slots have huge slack in
    # this memory-bound kernel, and exactness matches torch.softmax semantics.
    o_ref[...] = (e / denom).astype(o_ref.dtype)


def _pick_row_tile(n: int, m: int, itemsize: int, sublane: int) -> int:
    """Row tile that fits VMEM (incl. temporaries) and keeps >= ~4 grid steps."""
    budget = _vmem_capacity_bytes() // 2     # leave half of physical VMEM as headroom
    # Per block row: 2 input + 2 output pipeline buffers (kernel dtype) plus the
    # in-kernel f32 cast and exp() temporaries (f32 each).
    per_row = (4 * itemsize + 2 * 4) * m
    tr = budget // max(per_row, 1)
    # >= ~4 grid steps (>= 2 per TensorCore on v7x) before growing to the VMEM cap.
    tr = min(tr, max(sublane, n // 4))
    tr = max(sublane, (tr // sublane) * sublane)
    return min(tr, 512)


def _softmax_tiny(A: jax.Array) -> jax.Array:
    """Single no-grid block; columns padded to a 128-lane-dense layout."""
    n, m = A.shape
    dtype = A.dtype

    m_pad = max(_LANE, pl.cdiv(m, _LANE) * _LANE)
    a_in = A
    if m_pad != m:
        # Very negative fill: exp(fill - row_max) == 0, softmax of real cols unchanged.
        fill = float(jnp.finfo(jnp.float32).min)
        a_in = jnp.pad(A, ((0, 0), (0, m_pad - m)), constant_values=fill)

    out = pl.pallas_call(
        _softmax_rows_kernel,
        out_shape=jax.ShapeDtypeStruct((n, m_pad), dtype),
        # Explicit whole-array-in-VMEM placement (rows->sublanes, cols->lanes).
        in_specs=[pl.BlockSpec(memory_space=pltpu.MemorySpace.VMEM)],
        out_specs=pl.BlockSpec(memory_space=pltpu.MemorySpace.VMEM),
        compiler_params=pltpu.CompilerParams(vmem_limit_bytes=_vmem_limit_bytes()),
    )(a_in)
    return out[:, :m] if m_pad != m else out


def learnable_adjacency_forward(A: jax.Array, row_tile: int | None = None) -> jax.Array:
    """softmax(A, axis=-1) computed with Pallas TPU kernels."""
    n, m = A.shape
    dtype = A.dtype
    itemsize = jnp.dtype(dtype).itemsize
    # Sublane packing: 8 rows for 4-byte dtypes, 16 for bf16, 32 for int8/fp8.
    sublane = max(8, 32 // itemsize)

    if row_tile is None:
        if n * m * itemsize <= _TINY_BYTES:
            return _softmax_tiny(A)
        row_tile = _pick_row_tile(n, m, itemsize, sublane)
    else:
        row_tile = max(sublane, (int(row_tile) // sublane) * sublane)

    if row_tile >= n:
        return _softmax_tiny(A)

    grid = (pl.cdiv(n, row_tile),)
    return pl.pallas_call(
        _softmax_rows_kernel,
        out_shape=jax.ShapeDtypeStruct((n, m), dtype),
        grid=grid,
        # Full lane (column) extent per block: the softmax reduction never
        # crosses blocks.  The padded tail row-block computes on padding and is
        # dropped -- benign since rows are independent (no extra masking work).
        in_specs=[pl.BlockSpec((row_tile, m), lambda i: (i, 0))],
        out_specs=pl.BlockSpec((row_tile, m), lambda i: (i, 0)),
        compiler_params=pltpu.CompilerParams(
            dimension_semantics=("parallel",),        # shard rows across TCs on v7x
            vmem_limit_bytes=_vmem_limit_bytes(),     # generation-aware scoped budget
        ),
    )(A)


def init_learnable_adjacency(key, num_nodes: int) -> jax.Array:
    """Deterministic parameter init matching the PyTorch __init__."""
    noise = 0.01 * jax.random.normal(key, (num_nodes, num_nodes), dtype=jnp.float32)
    return jnp.eye(num_nodes, dtype=jnp.float32) + noise


if __name__ == "__main__":
    key = jax.random.PRNGKey(0)
    k1, k2 = jax.random.split(key)

    # --- Primary case: module-sized graph (num_nodes=16) -> tiny lane-padded path. ---
    num_nodes = 16
    A = init_learnable_adjacency(k1, num_nodes)
    out = jax.block_until_ready(learnable_adjacency_forward(A))

    ref = jax.nn.softmax(A, axis=-1)
    assert out.shape == (num_nodes, num_nodes)
    assert out.dtype == jnp.float32
    # Exact division -> tight tolerances (no approx-reciprocal slack needed).
    assert jnp.allclose(out, ref, atol=1e-5, rtol=1e-5)
    assert jnp.allclose(jnp.sum(out, axis=-1), 1.0, atol=1e-5)

    # --- Secondary case: larger graph exercising the row-tiled, pipelined path. ---
    n_big = 512
    A_big = init_learnable_adjacency(k2, n_big)

    out_big = jax.block_until_ready(learnable_adjacency_forward(A_big))
    ref_big = jax.nn.softmax(A_big, axis=-1)
    assert out_big.shape == (n_big, n_big)
    assert jnp.allclose(out_big, ref_big, atol=1e-5, rtol=1e-5)
    assert jnp.allclose(jnp.sum(out_big, axis=-1), 1.0, atol=1e-5)

    # Explicit user tile (rounded to sublane alignment) also hits the tiled path.
    out_big2 = jax.block_until_ready(learnable_adjacency_forward(A_big, row_tile=64))
    assert jnp.allclose(out_big2, ref_big, atol=1e-5, rtol=1e-5)

    print("KERNEL_OK")
</pallas_src>

<mosaic_0001>
module attributes {stable_mosaic.version = 11 : i64} {
  func.func @_softmax_rows_kernel(%arg0: memref<16x128xf32, #tpu.memory_space<vmem>>, %arg1: memref<16x128xf32, #tpu.memory_space<vmem>>) attributes {dimension_semantics = [], scalar_prefetch = 0 : i64, scratch_operands = 0 : i64, tpu.core_type = #tpu.core_type<tc>} {
    %c0 = arith.constant 0 : index
    %c0_0 = arith.constant 0 : index
    %0 = vector.load %arg0[%c0, %c0_0] : memref<16x128xf32, #tpu.memory_space<vmem>>, vector<16x128xf32>
    %cst = arith.constant dense<0xFF800000> : vector<16xf32>
    %1 = vector.multi_reduction <maximumf>, %0, %cst [1] : vector<16x128xf32> to vector<16xf32>
    %2 = vector.shape_cast %1 : vector<16xf32> to vector<16x1xf32>
    %3 = vector.broadcast %2 : vector<16x1xf32> to vector<16x128xf32>
    %4 = arith.subf %0, %3 : vector<16x128xf32>
    %5 = math.exp %4 : vector<16x128xf32>
    %cst_1 = arith.constant dense<0.000000e+00> : vector<16xf32>
    %6 = vector.multi_reduction <add>, %5, %cst_1 [1] : vector<16x128xf32> to vector<16xf32>
    %7 = vector.shape_cast %6 : vector<16xf32> to vector<16x1xf32>
    %8 = vector.broadcast %7 : vector<16x1xf32> to vector<16x128xf32>
    %9 = arith.divf %5, %8 : vector<16x128xf32>
    %c0_2 = arith.constant 0 : index
    %c0_3 = arith.constant 0 : index
    %10 = vector.load %arg1[%c0_2, %c0_3] : memref<16x128xf32, #tpu.memory_space<vmem>>, vector<16x128xf32>
    tpu.vector_store %arg1[%c0_2, %c0_3], %9 {strides = array<i32>} : memref<16x128xf32, #tpu.memory_space<vmem>>, vector<16x128xf32>,
    return
  }
}

</mosaic_0001>

<bundles_post_ra>
// kernel: tpu_custom_call.1
= control target key start
LH: loop header
LB: loop body
LE: loop exit
PB: predicated region body
PF: predicated region fallthrough
CT: control target
= control target key end

     0   :  { %6 = vsyncpa [#allocation3], 0  ;;  %s166_s0 = inlined_call_operand.hbm [shape: f32[16,128], index: 0, kind: input, shape index: {}]   ;;  %s167_s1 = inlined_call_operand.hbm [shape: f32[16,128], index: 1, kind: output, shape index: {}]  }
   0x1   :  { %7 = vsyncpa [#allocation4], 0  ;;  %s122_s6 = smov [#allocation2]   ;;  %s74_s10 = scalar_lea.hbm %s166_s0, 256 }
   0x2   :  { %s13_s7 = sshll.u32 %s122_s6, 4  ;;  %p75_p0 = scmp.ne.s32.totalorder %s166_s0, %s74_s10  ;;  %s14_s7 = int_to_ptr.vmem [resolvable:$true] %s13_s7 }
   0x3   :  { %p78_p1 = scmp.lt.u32.totalorder %s74_s10, %s166_s0 }
   0x5   :  { %p80_p2 = pnand %p78_p1, %p75_p0 }
   0x7   :  { %83 = shalt.err (!%p80_p2)
}
   0x8   :  { %s84_s15 = scalar_lea.vmem %s14_s7, 256  ;;  %p89_p4 = scmp.lt.s32.totalorder %s14_s7, %s14_s7 }
   0x9   :  { %p85_p3 = scmp.ne.s32.totalorder %s14_s7, %s84_s15  ;;  %p90_p5 = scmp.lt.s32.totalorder %s84_s15, %s84_s15 }
   0xb   :  { %p91_p6 = por %p90_p5, %p89_p4 }
   0xd   :  { %p92_p7 = pnand %p91_p6, %p85_p3 }
   0xf   :  { %95 = shalt.err (!%p92_p7)
}
  0x10   :  { %s123_s16 = smov 128   ;;  %s124_s17 = smov 8  }
  0x11   :  { %19 = dma.hbm_to_vmem [thread:$0]  %s166_s0, 256, %s14_s7, [#allocation3], %s123_s16, %s123_s16, %s124_s17  }
  0x12   :  { %118 = dma.done.wait [#allocation3], 256  }
  0x13   :  { %119 = vsyncadd [#allocation3], 4294967040  ;;  %v23_v0 = vld [vmem:[#allocation2] sm:$0xff]  ;;  %v24_v1 = vld [vmem:[#allocation2 + $0x8] sm:$0xff]  ;;  %s125_s0 = smov [#allocation5]  }
  0x14   :  { %25 = vmax.xlane.f32.xlu0 %v23_v0  ;;  %s50_s20 = sshll.u32 %s125_s0, 4  ;;  %s51_s20 = int_to_ptr.vmem [resolvable:$true] %s50_s20 }
  0x15   :  { %s96_s21 = scalar_lea.vmem %s51_s20, 256  ;;  %p101_p9 = scmp.lt.s32.totalorder %s51_s20, %s51_s20 }
  0x16   :  { %p97_p8 = scmp.ne.s32.totalorder %s51_s20, %s96_s21  ;;  %p102_p10 = scmp.lt.s32.totalorder %s96_s21, %s96_s21 }
  0x18   :  { %27 = vmax.xlane.f32.xlu0 %v24_v1  ;;  %p103_p11 = por %p102_p10, %p101_p9 }
  0x1a   :  { %p104_p12 = pnand %p103_p11, %p97_p8 }
  0xa1   :  { %v26_v2 = vpop.xlane.xlu0 %25 }
  0xa2   :  { %v29_v3 = vsub.f32 %v23_v0, %v26_v2 }
  0xa4   :  { %v31_v4 = vmul.f32 1.442695, %v29_v3 }
  0xa5   :  { %v28_v5 = vpop.xlane.xlu0 %27 }
  0xa6   :  { %66 = vpow2.f32 %v31_v4  ;;  %v30_v6 = vsub.f32 %v24_v1, %v28_v5 }
  0xa8   :  { %v33_v7 = vmul.f32 1.442695, %v30_v6 }
  0xaa   :  { %68 = vpow2.f32 %v33_v7 }
  0xb0   :  { %v67_v8 = vpop.eup %66 }
  0xb1   :  { %35 = vadd.xlane.f32.xlu1 %v67_v8 }
  0xb4   :  { %v69_v9 = vpop.eup %68 }
  0xb5   :  { %37 = vadd.xlane.f32.xlu1 %v69_v9 }
 0x13e   :  { %v36_v10 = vpop.xlane.xlu1 %35 }
 0x13f   :  { %70 = vrcp.f32 %v36_v10 }
 0x142   :  { %v38_v11 = vpop.xlane.xlu1 %37 }
 0x143   :  { %72 = vrcp.f32 %v38_v11 }
 0x149   :  { %v71_v12 = vpop.eup %70 }
 0x14a   :  { %v40_v13 = vmul.f32 %v71_v12, %v67_v8 }
 0x14c   :  { %43 = vst [vmem:[#allocation5] sm:$0xff] %v40_v13 }
 0x14d   :  { %v73_v14 = vpop.eup %72 }
 0x14e   :  { %v42_v15 = vmul.f32 %v73_v14, %v69_v9 }
 0x150   :  { %44 = vst [vmem:[#allocation5 + $0x8] sm:$0xff] %v42_v15 }
 0x151   :  { %107 = shalt.err (!%p104_p12)
}
 0x152   :  { %s108_s24 = scalar_lea.hbm %s167_s1, 256 }
 0x153   :  { %p109_p13 = scmp.ne.s32.totalorder %s167_s1, %s108_s24  ;;  %p112_p0 = scmp.lt.u32.totalorder %s108_s24, %s167_s1 }
 0x155   :  { %p114_p1 = pnand %p112_p0, %p109_p13 }
 0x157   :  { %117 = shalt.err (!%p114_p1)
}
 0x158   :  { %56 = dma.vmem_to_hbm [thread:$0]  %s51_s20, 256, %s167_s1, [#allocation4], %s123_s16, %s123_s16, %s124_s17  }
 0x159   :  { %120 = dma.done.wait [#allocation4], 256  }
 0x15a   :  { %121 = vsyncadd [#allocation4], 4294967040 }
 0x15b   :  { %60 = vsyncpa [#allocation3], 1 }
 0x15c   :  { %61 = vsyncpa [#allocation4], 1 }

</bundles_post_ra>
